<compile_context>
chip_gen: v7x
topology: tpu7x:2x2x1
jax: 0.10.0
libtpu: 0.0.40
codegen_flags: <defaults>
</compile_context>

<pallas_src>
import math

import jax
import jax.numpy as jnp
from jax import lax
from jax.experimental import pallas as pl
from jax.experimental.pallas import tpu as pltpu

BN_EPS = 1e-5


def _round_up(x, m):
    return ((x + m - 1) // m) * m


# ----------------------------------------------------------------------------
# Pallas head kernel: fused (fc + BN1d + fc1) matmul -> relu -> fc2 -> sigmoid
# ----------------------------------------------------------------------------
def head_kernel(feat_ref, w_ref, b_ref, w2_ref, b2_ref, out_ref):
    # features.fc (2048->128) + eval BatchNorm1d + fc1 (128->32), folded into a
    # single (2048, 32) bf16 weight in the wrapper.  bf16 MXU matmul, f32 acc.
    h = jnp.dot(feat_ref[...], w_ref[...],
                preferred_element_type=jnp.float32) + b_ref[...]
    h = jnp.maximum(h, 0.0)                      # F.relu(self.fc1(x))

    # TODO(synk): nn.Dropout is identity in eval mode; training-mode dropout
    # would need pltpu.prng_seed / pltpu.prng_random_bits masking here.

    # torch.sigmoid(self.fc2(x)): fc2 is 32 -> 1; a 1-wide MXU matmul wastes
    # the systolic array, so do it as a VPU multiply + lane reduction instead.
    o = jnp.sum(h * w2_ref[...], axis=-1, keepdims=True) + b2_ref[0]
    out_ref[...] = jax.nn.sigmoid(o)


def head_forward(feat, p):
    """feat: (N, 2048) pooled ResNet features -> (N, 1) f32 scores."""
    n = feat.shape[0]

    # Fold eval-mode BatchNorm1d into fc, then fold fc(+BN) into fc1 (exact,
    # both affine with no nonlinearity in between):
    #   inv    = gamma * rsqrt(var + eps)
    #   W_comb = (Wfc * inv) @ W1                              (2048, 32)
    #   b_comb = ((bfc - mean) * inv + beta) @ W1 + b1         (1, 32)
    inv = lax.rsqrt(p["var"] + BN_EPS) * p["gamma"]              # (1, 128)
    w_comb = ((p["wfc"] * inv) @ p["w1"]).astype(jnp.bfloat16)   # (2048, 32)
    b_comb = ((p["bfc"] - p["mean"]) * inv + p["beta"]) @ p["w1"] + p["b1"]
    w2_row = p["w2"].reshape(1, -1).astype(jnp.float32)          # (1, 32)
    b2_s = p["b2"].reshape(-1).astype(jnp.float32)               # (1,) SMEM scalar

    feat = feat.astype(jnp.bfloat16)   # no-op: the bf16 trunk already emits bf16

    # Batch tiling: large tiles amortize the ~0.35us/step pipeline overhead
    # (kernel is HBM-bound on feat bytes); cap so the (parallel) batch grid
    # keeps >=2-4 steps so both v7x TensorCores stay busy.  No full-array pad:
    # a non-divisible last block is clipped by Pallas and its rows sliced off.
    if n <= 8:
        tile_n = n                     # whole-batch block (full-dim tiling rule)
    else:
        tile_n = max(8, min(1024, _round_up(-(-n // 4), 8)))
    num_tiles = pl.cdiv(n, tile_n)

    out = pl.pallas_call(
        head_kernel,
        out_shape=jax.ShapeDtypeStruct((num_tiles * tile_n, 1), jnp.float32),
        grid=(num_tiles,),
        in_specs=[
            pl.BlockSpec((tile_n, 2048), lambda i: (i, 0)),      # feat stream
            pl.BlockSpec((2048, 32), lambda i: (0, 0)),          # fused W (resident)
            pl.BlockSpec((1, 32), lambda i: (0, 0)),             # fused bias
            pl.BlockSpec((1, 32), lambda i: (0, 0)),             # fc2 weight row
            pl.BlockSpec(memory_space=pltpu.MemorySpace.SMEM),   # fc2 bias scalar
        ],
        out_specs=pl.BlockSpec((tile_n, 1), lambda i: (i, 0)),
        compiler_params=pltpu.CompilerParams(
            dimension_semantics=("parallel",)),
    )(feat, w_comb, b_comb, w2_row, b2_s)
    return out[:n]


# ----------------------------------------------------------------------------
# Plain-JAX ResNet-50 trunk (bf16, NHWC).
# ----------------------------------------------------------------------------
def conv2d(x, w, stride=1, padding=0):
    return lax.conv_general_dilated(
        x, w, window_strides=(stride, stride),
        padding=((padding, padding), (padding, padding)),
        dimension_numbers=("NHWC", "HWIO", "NHWC"))


def bottleneck(x, p):
    s = p["stride"]
    out = jax.nn.relu(conv2d(x, p["w1"]))                         # 1x1 reduce
    out = jax.nn.relu(conv2d(out, p["w2"], stride=s, padding=1))  # 3x3
    out = conv2d(out, p["w3"])                                    # 1x1 expand
    sc = conv2d(x, p["wd"], stride=s) if "wd" in p else x
    return jax.nn.relu(out + sc)


def resnet50_trunk(x, params):
    # NCHW f32 input -> NHWC bf16: bf16 convs run the MXU at full rate and the
    # pooled features come out already in bf16 for the Pallas head.
    x = jnp.transpose(x, (0, 2, 3, 1)).astype(jnp.bfloat16)
    # conv1 7x7 s2 p3 -> relu -> maxpool 3x3 s2 p1
    x = jax.nn.relu(conv2d(x, params["conv1"], stride=2, padding=3))
    neg_inf = jnp.array(-jnp.inf, dtype=x.dtype)
    x = lax.reduce_window(x, neg_inf, lax.max, (1, 3, 3, 1), (1, 2, 2, 1),
                          ((0, 0), (1, 1), (1, 1), (0, 0)))
    # TODO(synk): backbone BatchNorm2d layers are identity at PyTorch default
    # init in eval mode (gamma=1, beta=0, mean=0, var=1) and are folded away;
    # pretrained running stats would need folding into the conv weights.
    for p in params["blocks"]:
        x = bottleneck(x, p)
    # adaptive avg pool (1,1) + flatten -> (N, 2048); f32 accumulation, bf16
    # result so the head's cast is fused into the pooling epilogue.
    return jnp.mean(x, axis=(1, 2), dtype=jnp.float32).astype(jnp.bfloat16)


# ----------------------------------------------------------------------------
# Deterministic parameter construction
# ----------------------------------------------------------------------------
def he_conv(key, shape):  # HWIO
    fan_in = shape[0] * shape[1] * shape[2]
    w = jax.random.normal(key, shape, jnp.float32) * math.sqrt(2.0 / fan_in)
    return w.astype(jnp.bfloat16)


def linear_init(key, fan_in, fan_out):
    k1, k2 = jax.random.split(key)
    bound = 1.0 / math.sqrt(fan_in)
    w = jax.random.uniform(k1, (fan_in, fan_out), jnp.float32, -bound, bound)
    b = jax.random.uniform(k2, (1, fan_out), jnp.float32, -bound, bound)
    return w, b


def init_resnet50_params(key):
    keys = iter(jax.random.split(key, 256))
    params = {"conv1": he_conv(next(keys), (7, 7, 3, 64)), "blocks": []}
    layers_cfg = [(64, 3, 1), (128, 4, 2), (256, 6, 2), (512, 3, 2)]
    in_ch = 64
    for width, n_blocks, stride in layers_cfg:
        for i in range(n_blocks):
            p = {
                "stride": stride if i == 0 else 1,
                "w1": he_conv(next(keys), (1, 1, in_ch, width)),
                "w2": he_conv(next(keys), (3, 3, width, width)),
                "w3": he_conv(next(keys), (1, 1, width, width * 4)),
            }
            if i == 0:  # downsample (channel or stride mismatch)
                p["wd"] = he_conv(next(keys), (1, 1, in_ch, width * 4))
            params["blocks"].append(p)
            in_ch = width * 4
    return params


def single_net_forward(x, trunk_params, head_params):
    feat = resnet50_trunk(x, trunk_params)          # (N, 2048) bf16
    return head_forward(feat, head_params)          # (N, 1) f32, Pallas kernel


if __name__ == "__main__":
    key = jax.random.PRNGKey(0)
    kx, kbb, kfc, k1, k2 = jax.random.split(key, 5)

    # small but shape-consistent input (NCHW, 3-channel image)
    x = jax.random.normal(kx, (2, 3, 32, 32), jnp.float32)

    trunk_params = init_resnet50_params(kbb)

    wfc, bfc = linear_init(kfc, 2048, 128)   # replaced resnet fc (2048 -> 128)
    w1, b1 = linear_init(k1, 128, 32)        # self.fc1
    w2, b2 = linear_init(k2, 32, 1)          # self.fc2
    head_params = dict(
        wfc=wfc, bfc=bfc,
        gamma=jnp.ones((1, 128), jnp.float32),
        beta=jnp.zeros((1, 128), jnp.float32),
        mean=jnp.zeros((1, 128), jnp.float32),
        var=jnp.ones((1, 128), jnp.float32),
        w1=w1, b1=b1, w2=w2, b2=b2,
    )

    @jax.jit
    def forward(img):
        # params closed over: "stride" ints stay static, arrays become constants
        return single_net_forward(img, trunk_params, head_params)

    out = jax.block_until_ready(forward(x))
    assert out.shape == (2, 1) and out.dtype == jnp.float32
    assert bool(jnp.all(jnp.isfinite(out)))
    assert bool(jnp.all((out >= 0.0) & (out <= 1.0)))
    print("KERNEL_OK")
</pallas_src>

<mosaic_0001>
module attributes {stable_mosaic.version = 11 : i64} {
  func.func @head_kernel(%arg0: i32, %arg1: memref<2x2048xbf16, #tpu.memory_space<vmem>>, %arg2: memref<2048x32xbf16, #tpu.memory_space<vmem>>, %arg3: memref<1x32xf32, #tpu.memory_space<vmem>>, %arg4: memref<1x32xf32, #tpu.memory_space<vmem>>, %arg5: memref<1xf32, #tpu.memory_space<smem>>, %arg6: memref<2x1xf32, #tpu.memory_space<vmem>>) attributes {dimension_semantics = [#tpu.dimension_semantics<parallel>], iteration_bounds = array<i64: 1>, scalar_prefetch = 0 : i64, scratch_operands = 0 : i64, tpu.core_type = #tpu.core_type<tc>, window_params = [{transform_indices = @transform_0, window_bounds = array<i64: 2, 2048>}, {pipeline_mode = #tpu.pipeline_mode<synchronous>, transform_indices = @transform_1, window_bounds = array<i64: 2048, 32>}, {pipeline_mode = #tpu.pipeline_mode<synchronous>, transform_indices = @transform_2, window_bounds = array<i64: 1, 32>}, {pipeline_mode = #tpu.pipeline_mode<synchronous>, transform_indices = @transform_3, window_bounds = array<i64: 1, 32>}, {transform_indices = @transform_4, window_bounds = array<i64: 1>}, {transform_indices = @transform_5, window_bounds = array<i64: 2, 1>}]} {
    %c0 = arith.constant 0 : index
    %c0_0 = arith.constant 0 : index
    %0 = vector.load %arg1[%c0, %c0_0] : memref<2x2048xbf16, #tpu.memory_space<vmem>>, vector<2x2048xbf16>
    %c0_1 = arith.constant 0 : index
    %c0_2 = arith.constant 0 : index
    %1 = vector.load %arg2[%c0_1, %c0_2] : memref<2048x32xbf16, #tpu.memory_space<vmem>>, vector<2048x32xbf16>
    %cst = arith.constant dense<0.000000e+00> : vector<2x32xf32>
    %2 = tpu.matmul %0, %1, %cst {dimension_numbers = #tpu.dot_dimension_numbers<[1], [0], [0], [1], [0, 0, 1, 1], [], []>} : vector<2x2048xbf16>, vector<2048x32xbf16>, vector<2x32xf32> -> vector<2x32xf32>
    %c0_3 = arith.constant 0 : index
    %c0_4 = arith.constant 0 : index
    %3 = vector.load %arg3[%c0_3, %c0_4] : memref<1x32xf32, #tpu.memory_space<vmem>>, vector<1x32xf32>
    %4 = vector.broadcast %3 : vector<1x32xf32> to vector<2x32xf32>
    %5 = arith.addf %2, %4 : vector<2x32xf32>
    %cst_5 = arith.constant 0.000000e+00 : f32
    %6 = vector.broadcast %cst_5 : f32 to vector<2x32xf32>
    %7 = arith.maximumf %5, %6 : vector<2x32xf32>
    %c0_6 = arith.constant 0 : index
    %c0_7 = arith.constant 0 : index
    %8 = vector.load %arg4[%c0_6, %c0_7] : memref<1x32xf32, #tpu.memory_space<vmem>>, vector<1x32xf32>
    %9 = vector.broadcast %8 : vector<1x32xf32> to vector<2x32xf32>
    %10 = arith.mulf %7, %9 : vector<2x32xf32>
    %cst_8 = arith.constant dense<0.000000e+00> : vector<2xf32>
    %11 = vector.multi_reduction <add>, %10, %cst_8 [1] : vector<2x32xf32> to vector<2xf32>
    %12 = vector.shape_cast %11 : vector<2xf32> to vector<2x1xf32>
    %c0_9 = arith.constant 0 : index
    %13 = memref.load %arg5[%c0_9] : memref<1xf32, #tpu.memory_space<smem>>
    %14 = vector.broadcast %13 : f32 to vector<2x1xf32>
    %15 = arith.addf %12, %14 : vector<2x1xf32>
    %16 = arith.negf %15 : vector<2x1xf32>
    %17 = math.exp %16 : vector<2x1xf32>
    %cst_10 = arith.constant 1.000000e+00 : f32
    %18 = vector.broadcast %cst_10 : f32 to vector<2x1xf32>
    %19 = arith.addf %18, %17 : vector<2x1xf32>
    %20 = arith.divf %18, %19 : vector<2x1xf32>
    %c0_11 = arith.constant 0 : index
    %c0_12 = arith.constant 0 : index
    %21 = vector.load %arg6[%c0_11, %c0_12] : memref<2x1xf32, #tpu.memory_space<vmem>>, vector<2x1xf32>
    tpu.vector_store %arg6[%c0_11, %c0_12], %20 {strides = array<i32>} : memref<2x1xf32, #tpu.memory_space<vmem>>, vector<2x1xf32>,
    return
  }
  func.func @transform_0(%arg0: i32) -> (i32, i32) {
    %c0_i32 = arith.constant 0 : i32
    %c0_i32_0 = arith.constant 0 : i32
    return %arg0, %c0_i32 : i32, i32
  }
  func.func @transform_1(%arg0: i32) -> (i32, i32) {
    %c0_i32 = arith.constant 0 : i32
    %c0_i32_0 = arith.constant 0 : i32
    %c0_i32_1 = arith.constant 0 : i32
    return %c0_i32, %c0_i32_0 : i32, i32
  }
  func.func @transform_2(%arg0: i32) -> (i32, i32) {
    %c0_i32 = arith.constant 0 : i32
    %c0_i32_0 = arith.constant 0 : i32
    %c0_i32_1 = arith.constant 0 : i32
    return %c0_i32, %c0_i32_0 : i32, i32
  }
  func.func @transform_3(%arg0: i32) -> (i32, i32) {
    %c0_i32 = arith.constant 0 : i32
    %c0_i32_0 = arith.constant 0 : i32
    %c0_i32_1 = arith.constant 0 : i32
    return %c0_i32, %c0_i32_0 : i32, i32
  }
  func.func @transform_4(%arg0: i32) -> i32 {
    %c0_i32 = arith.constant 0 : i32
    %c0_i32_0 = arith.constant 0 : i32
    return %c0_i32 : i32
  }
  func.func @transform_5(%arg0: i32) -> (i32, i32) {
    %c0_i32 = arith.constant 0 : i32
    %c0_i32_0 = arith.constant 0 : i32
    return %arg0, %c0_i32 : i32, i32
  }
}

</mosaic_0001>

<bundles_post_ra>
// kernel: forward.1
= control target key start
LH: loop header
LB: loop body
LE: loop exit
PB: predicated region body
PF: predicated region fallthrough
CT: control target
= control target key end

     0   :  { %v1961_v22 = vmov 1966171168   ;;  %v293_v24 = vlaneseq  ;;  %vm1500_vm0 = vcmask 254976   ;;  %vm1513_vm1 = vcmask 1024   ;;  %s2428_s1 = inlined_call_operand.vmem [shape: bf16[2048,32], index: 1, kind: input, shape index: {}]   ;;  %s2429_s0 = inlined_call_operand.vmem [shape: bf16[2,2048], index: 0, kind: input, shape index: {}]   ;;  %s2430_s2 = inlined_call_operand.vmem [shape: f32[1,32], index: 2, kind: input, shape index: {}]   ;;  %s2431_s3 = inlined_call_operand.vmem [shape: f32[1,32], index: 3, kind: input, shape index: {}]   ;;  %s2432_s4 = inlined_call_operand.<no memory space> [shape: f32[1], index: 4, kind: input, shape index: {}]   ;;  %s2433_s5 = inlined_call_operand.vmem [shape: f32[2,1], index: 5, kind: output, shape index: {}]  }
   0x1   :  { %v1827_v0 = vld [vmem:[%s2428_s1 + $0x40] sm:$0xff]   ;;  %v1831_v4 = vld [vmem:[%s2428_s1 + $0x48] sm:$0xff]   ;;  %v1835_v8 = vld [vmem:[%s2428_s1 + $0x50] sm:$0xff]   ;;  %v291_v23 = vunpack.c.l.s4 %v1961_v22 }
   0x2   :  { %v1828_v1 = vld [vmem:[%s2428_s1 + $0xc0] sm:$0xff]   ;;  %1650 = vmatprep.subr.bf16.mxu0 %v1827_v0  ;;  %v1832_v5 = vld [vmem:[%s2428_s1 + $0xc8] sm:$0xff]   ;;  %v1836_v9 = vld [vmem:[%s2428_s1 + $0xd0] sm:$0xff]   ;;  %v294_v30 = vshrl.u32 %v293_v24, 7 }
   0x3   :  { %v1829_v2 = vld [vmem:[%s2428_s1] sm:$0xff]   ;;  %1672 = vmatprep.subr.bf16.mxu1 %v1828_v1  ;;  %v1833_v6 = vld [vmem:[%s2428_s1 + $0x8] sm:$0xff]   ;;  %v1837_v10 = vld [vmem:[%s2428_s1 + $0x10] sm:$0xff]   ;;  %v292_v29 = vunpack.c.0.s8 %v291_v23 }
   0x4   :  { %v1830_v3 = vld [vmem:[%s2428_s1 + $0x80] sm:$0xff]   ;;  %1651 = vmatpush3.bf16.msra.mxu0 %v1829_v2  ;;  %v1834_v7 = vld [vmem:[%s2428_s1 + $0x88] sm:$0xff]   ;;  %v1838_v11 = vld [vmem:[%s2428_s1 + $0x90] sm:$0xff]  }
   0x5   :  { %1673 = vmatpush3.bf16.msra.mxu1 %v1830_v3  ;;  %1652 = vmatprep.subr.bf16.mxu0 %v1831_v4  ;;  %v1839_v12 = vld [vmem:[%s2428_s1 + $0x58] sm:$0xff]   ;;  %v1843_v16 = vld [vmem:[%s2428_s1 + $0x60] sm:$0xff]   ;;  %v1847_v20 = vld [vmem:[%s2428_s1 + $0x68] sm:$0xff]   ;;  %v2082_v35 = vsub.s32 %v292_v29, %v294_v30 }
   0x6   :  { %1674 = vmatprep.subr.bf16.mxu1 %v1832_v5  ;;  %v1840_v13 = vld [vmem:[%s2428_s1 + $0xd8] sm:$0xff]   ;;  %v1844_v17 = vld [vmem:[%s2428_s1 + $0xe0] sm:$0xff]   ;;  %v1848_v21 = vld [vmem:[%s2428_s1 + $0xe8] sm:$0xff]  }
   0x7   :  { %v1841_v14 = vld [vmem:[%s2428_s1 + $0x18] sm:$0xff]   ;;  %v1845_v18 = vld [vmem:[%s2428_s1 + $0x20] sm:$0xff]   ;;  %v1849_v25 = vld [vmem:[%s2428_s1 + $0x28] sm:$0xff]  }
   0x8   :  { %1653 = vmatpush3.bf16.msra.mxu0 %v1833_v6  ;;  %v1842_v15 = vld [vmem:[%s2428_s1 + $0x98] sm:$0xff]   ;;  %v1846_v19 = vld [vmem:[%s2428_s1 + $0xa0] sm:$0xff]   ;;  %v1850_v26 = vld [vmem:[%s2428_s1 + $0xa8] sm:$0xff]  }
   0x9   :  { %1675 = vmatpush3.bf16.msra.mxu1 %v1834_v7  ;;  %1654 = vmatprep.subr.bf16.mxu0 %v1835_v8  ;;  %v1851_v27 = vld [vmem:[%s2428_s1 + $0x70] sm:$0xff]   ;;  %v1855_v33 = vld [vmem:[%s2428_s1 + $0x78] sm:$0xff]   ;;  %v22_v38 = vld [vmem:[%s2429_s0] sm:$0xff] }
   0xa   :  { %1676 = vmatprep.subr.bf16.mxu1 %v1836_v9  ;;  %v1852_v28 = vld [vmem:[%s2428_s1 + $0xf0] sm:$0xff]   ;;  %v1856_v34 = vld [vmem:[%s2428_s1 + $0xf8] sm:$0xff]   ;;  %v289_v39 = vcombine.high %v22_v38, %v22_v38  ;;  %v296_v40 = vrot.slane %v22_v38, %v2082_v35  ;;  %v1861_v41 = vld [vmem:[%s2428_s1 + $0x140] sm:$0xff]  }
   0xb   :  { %v1853_v31 = vld [vmem:[%s2428_s1 + $0x30] sm:$0xff]   ;;  %v1857_v36 = vld [vmem:[%s2428_s1 + $0x38] sm:$0xff]   ;;  %v1862_v42 = vld [vmem:[%s2428_s1 + $0x1c0] sm:$0xff]  }
   0xc   :  { %1655 = vmatpush3.bf16.msra.mxu0 %v1837_v10  ;;  %v1854_v32 = vld [vmem:[%s2428_s1 + $0xb0] sm:$0xff]   ;;  %v1858_v37 = vld [vmem:[%s2428_s1 + $0xb8] sm:$0xff]   ;;  %v304_v43 = vcombine.high %v296_v40, %v296_v40  ;;  %v312_v44 = vrot.slane %v296_v40, %v2082_v35  ;;  %v2102_v45 = vrot.slane %v289_v39, %v2082_v35  ;;  %v1863_v47 = vld [vmem:[%s2428_s1 + $0x100] sm:$0xff]  }
   0xd   :  { %1677 = vmatpush3.bf16.msra.mxu1 %v1838_v11  ;;  %1656 = vmatprep.subr.bf16.mxu0 %v1839_v12  ;;  %v1865_v50 = vld [vmem:[%s2428_s1 + $0x148] sm:$0xff]   ;;  %v1864_v52 = vld [vmem:[%s2428_s1 + $0x180] sm:$0xff]   ;;  %v1869_v57 = vld [vmem:[%s2428_s1 + $0x150] sm:$0xff]  }
   0xe   :  { %1678 = vmatprep.subr.bf16.mxu1 %v1840_v13  ;;  %v326_v46 = vrot.slane %v304_v43, %v2082_v35  ;;  %v305_v48 = vcombine.high %v2102_v45, %v2102_v45  ;;  %v334_v49 = vcombine.high %v312_v44, %v312_v44  ;;  %v1866_v54 = vld [vmem:[%s2428_s1 + $0x1c8] sm:$0xff]   ;;  %v1870_v59 = vld [vmem:[%s2428_s1 + $0x1d0] sm:$0xff]   ;;  %v1873_v61 = vld [vmem:[%s2428_s1 + $0x158] sm:$0xff]  }
   0xf   :  { %v1867_v55 = vld [vmem:[%s2428_s1 + $0x108] sm:$0xff]   ;;  %v1871_v60 = vld [vmem:[%s2428_s1 + $0x110] sm:$0xff]   ;;  %v1874_v63 = vld [vmem:[%s2428_s1 + $0x1d8] sm:$0xff]  }
  0x10   :  { %1657 = vmatpush3.bf16.msra.mxu0 %v1841_v14  ;;  %1203 = vmatprep.mubr.bf16.mxu0 %v326_v46  ;;  %v336_v51 = vcombine.high %v326_v46, %v326_v46  ;;  %v333_v53 = vrot.slane %v305_v48, %v2082_v35  ;;  %v1868_v58 = vld [vmem:[%s2428_s1 + $0x188] sm:$0xff]   ;;  %v1872_v62 = vld [vmem:[%s2428_s1 + $0x190] sm:$0xff]   ;;  %v1875_v0 = vld [vmem:[%s2428_s1 + $0x118] sm:$0xff]  }
  0x11   :  { %1679 = vmatpush3.bf16.msra.mxu1 %v1842_v15  ;;  %1658 = vmatprep.subr.bf16.mxu0 %v1843_v16  ;;  %v1877_v1 = vld [vmem:[%s2428_s1 + $0x160] sm:$0xff]   ;;  %v1876_v2 = vld [vmem:[%s2428_s1 + $0x198] sm:$0xff]   ;;  %v2162_v5 = vld [vmem:[%s2429_s0 + $0x8] sm:$0xff] }
  0x12   :  { %1680 = vmatprep.subr.bf16.mxu1 %v1844_v17  ;;  %1243 = vmatprep.mubr.bf16.mxu1 %v336_v51  ;;  %v337_v56 = vcombine.high %v333_v53, %v333_v53  ;;  %v1878_v3 = vld [vmem:[%s2428_s1 + $0x1e0] sm:$0xff]   ;;  %v1881_v6 = vld [vmem:[%s2428_s1 + $0x168] sm:$0xff]   ;;  %v1885_v10 = vld [vmem:[%s2428_s1 + $0x170] sm:$0xff]   ;;  %v2184_v12 = vrot.slane %v2162_v5, %v2082_v35  ;;  %v338_v46 = vcombine.high %v2162_v5, %v2162_v5 }
  0x13   :  { %v1879_v4 = vld [vmem:[%s2428_s1 + $0x120] sm:$0xff]   ;;  %v1882_v8 = vld [vmem:[%s2428_s1 + $0x1e8] sm:$0xff]   ;;  %v1886_v13 = vld [vmem:[%s2428_s1 + $0x1f0] sm:$0xff]  }
  0x14   :  { %1659 = vmatpush3.bf16.msra.mxu0 %v1845_v18  ;;  %v1880_v7 = vld [vmem:[%s2428_s1 + $0x1a0] sm:$0xff]   ;;  %v1883_v9 = vld [vmem:[%s2428_s1 + $0x128] sm:$0xff]   ;;  %v1887_v14 = vld [vmem:[%s2428_s1 + $0x130] sm:$0xff]   ;;  %v353_v17 = vcombine.high %v2184_v12, %v2184_v12 }
  0x15   :  { %1681 = vmatpush3.bf16.msra.mxu1 %v1846_v19  ;;  %1660 = vmatprep.subr.bf16.mxu0 %v1847_v20  ;;  %v1884_v11 = vld [vmem:[%s2428_s1 + $0x1a8] sm:$0xff]   ;;  %v1889_v15 = vld [vmem:[%s2428_s1 + $0x178] sm:$0xff]   ;;  %v1888_v16 = vld [vmem:[%s2428_s1 + $0x1b0] sm:$0xff]   ;;  %v319_v20 = vrot.slane %v2102_v45, %v2082_v35 }
  0x16   :  { %1682 = vmatprep.subr.bf16.mxu1 %v1848_v21  ;;  %v1890_v18 = vld [vmem:[%s2428_s1 + $0x1f8] sm:$0xff]   ;;  %v1893_v21 = vld [vmem:[%s2428_s1 + $0x240] sm:$0xff]   ;;  %v375_v23 = vrot.slane %v353_v17, %v2082_v35  ;;  %v1898_v30 = vld [vmem:[%s2428_s1 + $0x2c8] sm:$0xff]  }
  0x17   :  { %v1891_v19 = vld [vmem:[%s2428_s1 + $0x138] sm:$0xff]   ;;  %v1894_v24 = vld [vmem:[%s2428_s1 + $0x2c0] sm:$0xff]   ;;  %v1904_v38 = vld [vmem:[%s2428_s1 + $0x290] sm:$0xff]  }
  0x18   :  { %1661 = vmatpush3.bf16.msra.mxu0 %v1849_v25  ;;  %v1892_v22 = vld [vmem:[%s2428_s1 + $0x1b8] sm:$0xff]   ;;  %v1895_v25 = vld [vmem:[%s2428_s1 + $0x200] sm:$0xff]   ;;  %v385_v29 = vcombine.high %v375_v23, %v375_v23  ;;  %v1913_v45 = vld [vmem:[%s2428_s1 + $0x268] sm:$0xff]  }
  0x19   :  { %1683 = vmatpush3.bf16.msra.mxu1 %v1850_v26  ;;  %1662 = vmatprep.subr.bf16.mxu0 %v1851_v27  ;;  %v335_v26 = vcombine.high %v319_v20, %v319_v20  ;;  %v1897_v27 = vld [vmem:[%s2428_s1 + $0x248] sm:$0xff]   ;;  %v1906_v39 = vld [vmem:[%s2428_s1 + $0x2d8] sm:$0xff]   ;;  %v1910_v43 = vld [vmem:[%s2428_s1 + $0x2e0] sm:$0xff]  }
  0x1a   :  { %1684 = vmatprep.subr.bf16.mxu1 %v1852_v28  ;;  %v1896_v28 = vld [vmem:[%s2428_s1 + $0x280] sm:$0xff]   ;;  %v1907_v40 = vld [vmem:[%s2428_s1 + $0x218] sm:$0xff]   ;;  %v1914_v48 = vld [vmem:[%s2428_s1 + $0x2e8] sm:$0xff]  }
  0x1b   :  { %v1916_v51 = vld [vmem:[%s2428_s1 + $0x2a8] sm:$0xff]   ;;  %v1940_v17 = vld [vmem:[%s2428_s1 + $0x398] sm:$0xff]  }
  0x1c   :  { %1663 = vmatpush3.bf16.msra.mxu0 %v1853_v31  ;;  %v1899_v31 = vld [vmem:[%s2428_s1 + $0x208] sm:$0xff]  }
  0x1d   :  { %1685 = vmatpush3.bf16.msra.mxu1 %v1854_v32  ;;  %1664 = vmatprep.subr.bf16.mxu0 %v1855_v33  ;;  %v1901_v32 = vld [vmem:[%s2428_s1 + $0x250] sm:$0xff]   ;;  %v1900_v33 = vld [vmem:[%s2428_s1 + $0x288] sm:$0xff]  }
  0x1e   :  { %1686 = vmatprep.subr.bf16.mxu1 %v1856_v34  ;;  %v1902_v34 = vld [vmem:[%s2428_s1 + $0x2d0] sm:$0xff]  }
  0x20   :  { %1665 = vmatpush3.bf16.msra.mxu0 %v1857_v36  ;;  %v1903_v36 = vld [vmem:[%s2428_s1 + $0x210] sm:$0xff]  }
  0x21   :  { %1687 = vmatpush3.bf16.msra.mxu1 %v1858_v37  ;;  %1694 = vmatprep.subr.bf16.mxu0 %v1861_v41  ;;  %v1905_v37 = vld [vmem:[%s2428_s1 + $0x258] sm:$0xff]   ;;  %v1909_v41 = vld [vmem:[%s2428_s1 + $0x260] sm:$0xff]  }
  0x22   :  { %1716 = vmatprep.subr.bf16.mxu1 %v1862_v42  ;;  %v1908_v42 = vld [vmem:[%s2428_s1 + $0x298] sm:$0xff]  }
  0x23   :  { %1204 = vmatmul.mubr.bf16.vlgmr.msra.gmra.mrb[0].mxu0 %v312_v44  ;;  %v1911_v44 = vld [vmem:[%s2428_s1 + $0x220] sm:$0xff]  }
  0x24   :  { %1695 = vmatpush3.bf16.msra.mxu0 %v1863_v47  ;;  %1244 = vmatmul.mubr.bf16.vlgmr.msra.gmra.mrb[0].mxu1 %v334_v49  ;;  %v1912_v47 = vld [vmem:[%s2428_s1 + $0x2a0] sm:$0xff]   ;;  %v1915_v49 = vld [vmem:[%s2428_s1 + $0x228] sm:$0xff]  }
  0x25   :  { %1696 = vmatprep.subr.bf16.mxu0 %v1865_v50  ;;  %1717 = vmatpush3.bf16.msra.mxu1 %v1864_v52  ;;  %v1917_v50 = vld [vmem:[%s2428_s1 + $0x270] sm:$0xff]   ;;  %v2290_v52 = vrot.slane %v338_v46, %v2082_v35 }
  0x26   :  { %1283 = vmatprep.mubr.bf16.mxu0 %v333_v53  ;;  %1718 = vmatprep.subr.bf16.mxu1 %v1866_v54  ;;  %v1918_v53 = vld [vmem:[%s2428_s1 + $0x2f0] sm:$0xff]  }
  0x27   :  { %1323 = vmatprep.mubr.bf16.mxu1 %v337_v56  ;;  %v1919_v54 = vld [vmem:[%s2428_s1 + $0x230] sm:$0xff]  }
  0x28   :  { %1697 = vmatpush3.bf16.msra.mxu0 %v1867_v55  ;;  %v1921_v55 = vld [vmem:[%s2428_s1 + $0x278] sm:$0xff]   ;;  %v1920_v56 = vld [vmem:[%s2428_s1 + $0x2b0] sm:$0xff]  }
  0x29   :  { %1698 = vmatprep.subr.bf16.mxu0 %v1869_v57  ;;  %1719 = vmatpush3.bf16.msra.mxu1 %v1868_v58  ;;  %v354_v57 = vcombine.high %v2290_v52, %v2290_v52  ;;  %v1922_v58 = vld [vmem:[%s2428_s1 + $0x2f8] sm:$0xff]  }
  0x2a   :  { %1720 = vmatprep.subr.bf16.mxu1 %v1870_v59  ;;  %v1923_v59 = vld [vmem:[%s2428_s1 + $0x238] sm:$0xff]  }
  0x2c   :  { %1699 = vmatpush3.bf16.msra.mxu0 %v1871_v60  ;;  %v361_v60 = vrot.slane %v2184_v12, %v2082_v35  ;;  %v1937_v12 = vld [vmem:[%s2428_s1 + $0x358] sm:$0xff]  }
  0x2d   :  { %1700 = vmatprep.subr.bf16.mxu0 %v1873_v61  ;;  %1721 = vmatpush3.bf16.msra.mxu1 %v1872_v62  ;;  %v1925_v61 = vld [vmem:[%s2428_s1 + $0x340] sm:$0xff]   ;;  %v1924_v62 = vld [vmem:[%s2428_s1 + $0x2b8] sm:$0xff]  }
  0x2e   :  { %1722 = vmatprep.subr.bf16.mxu1 %v1874_v63  ;;  %v382_v63 = vrot.slane %v354_v57, %v2082_v35 }
  0x30   :  { %1701 = vmatpush3.bf16.msra.mxu0 %v1875_v0  ;;  %v1926_v0 = vld [vmem:[%s2428_s1 + $0x3c0] sm:$0xff]   ;;  %v386_v5 = vcombine.high %v382_v63, %v382_v63 }
  0x31   :  { %1702 = vmatprep.subr.bf16.mxu0 %v1877_v1  ;;  %1723 = vmatpush3.bf16.msra.mxu1 %v1876_v2  ;;  %v1927_v1 = vld [vmem:[%s2428_s1 + $0x300] sm:$0xff]   ;;  %v383_v2 = vcombine.high %v361_v60, %v361_v60 }
  0x32   :  { %1724 = vmatprep.subr.bf16.mxu1 %v1878_v3  ;;  %v1929_v3 = vld [vmem:[%s2428_s1 + $0x348] sm:$0xff]  }
  0x34   :  { %1703 = vmatpush3.bf16.msra.mxu0 %v1879_v4  ;;  %v1928_v4 = vld [vmem:[%s2428_s1 + $0x380] sm:$0xff]  }
  0x35   :  { %1704 = vmatprep.subr.bf16.mxu0 %v1881_v6  ;;  %1725 = vmatpush3.bf16.msra.mxu1 %v1880_v7  ;;  %v1930_v6 = vld [vmem:[%s2428_s1 + $0x3c8] sm:$0xff]  }
  0x36   :  { %1726 = vmatprep.subr.bf16.mxu1 %v1882_v8  ;;  %v1931_v7 = vld [vmem:[%s2428_s1 + $0x308] sm:$0xff]   ;;  %v1933_v8 = vld [vmem:[%s2428_s1 + $0x350] sm:$0xff]  }
  0x38   :  { %1705 = vmatpush3.bf16.msra.mxu0 %v1883_v9  ;;  %v1932_v9 = vld [vmem:[%s2428_s1 + $0x388] sm:$0xff]  }
  0x39   :  { %1706 = vmatprep.subr.bf16.mxu0 %v1885_v10  ;;  %1727 = vmatpush3.bf16.msra.mxu1 %v1884_v11  ;;  %v1934_v10 = vld [vmem:[%s2428_s1 + $0x3d0] sm:$0xff]  }
  0x3a   :  { %1728 = vmatprep.subr.bf16.mxu1 %v1886_v13  ;;  %v1935_v11 = vld [vmem:[%s2428_s1 + $0x310] sm:$0xff]  }
  0x3b   :  { %v1936_v13 = vld [vmem:[%s2428_s1 + $0x390] sm:$0xff]  }
  0x3c   :  { %1707 = vmatpush3.bf16.msra.mxu0 %v1887_v14  ;;  %v1938_v14 = vld [vmem:[%s2428_s1 + $0x3d8] sm:$0xff]  }
  0x3d   :  { %1708 = vmatprep.subr.bf16.mxu0 %v1889_v15  ;;  %1729 = vmatpush3.bf16.msra.mxu1 %v1888_v16  ;;  %v1939_v15 = vld [vmem:[%s2428_s1 + $0x318] sm:$0xff]   ;;  %v1941_v16 = vld [vmem:[%s2428_s1 + $0x360] sm:$0xff]  }
  0x3e   :  { %1730 = vmatprep.subr.bf16.mxu1 %v1890_v18  ;;  %v1942_v18 = vld [vmem:[%s2428_s1 + $0x3e0] sm:$0xff]  }
  0x40   :  { %1709 = vmatpush3.bf16.msra.mxu0 %v1891_v19  ;;  %v1943_v19 = vld [vmem:[%s2428_s1 + $0x320] sm:$0xff]  }
  0x41   :  { %1738 = vmatprep.subr.bf16.mxu0 %v1893_v21  ;;  %1731 = vmatpush3.bf16.msra.mxu1 %v1892_v22  ;;  %v1944_v21 = vld [vmem:[%s2428_s1 + $0x3a0] sm:$0xff]   ;;  %v1946_v22 = vld [vmem:[%s2428_s1 + $0x3e8] sm:$0xff]  }
  0x42   :  { %1760 = vmatprep.subr.bf16.mxu1 %v1894_v24  ;;  %v1949_v24 = vld [vmem:[%s2428_s1 + $0x370] sm:$0xff]  }
  0x43   :  { %1284 = vmatmul.mubr.bf16.vlgmr.msra.gmra.mrb[4].mxu0 %v319_v20  ;;  %v1945_v20 = vld [vmem:[%s2428_s1 + $0x368] sm:$0xff]  }
  0x44   :  { %1739 = vmatpush3.bf16.msra.mxu0 %v1895_v25  ;;  %1363 = vmatprep.mubr.bf16.mxu0 %v375_v23  ;;  %v1947_v23 = vld [vmem:[%s2428_s1 + $0x328] sm:$0xff]  }
  0x45   :  { %1324 = vmatmul.mubr.bf16.vlgmr.msra.gmra.mrb[4].mxu1 %v335_v26  ;;  %1740 = vmatprep.subr.bf16.mxu0 %v1897_v27  ;;  %v1948_v25 = vld [vmem:[%s2428_s1 + $0x3a8] sm:$0xff]   ;;  %v1950_v26 = vld [vmem:[%s2428_s1 + $0x3f0] sm:$0xff]  }
  0x46   :  { %1761 = vmatpush3.bf16.msra.mxu1 %v1896_v28  ;;  %1403 = vmatprep.mubr.bf16.mxu1 %v385_v29  ;;  %v1951_v27 = vld [vmem:[%s2428_s1 + $0x330] sm:$0xff]   ;;  %v1953_v28 = vld [vmem:[%s2428_s1 + $0x378] sm:$0xff]  }
  0x47   :  { %1762 = vmatprep.subr.bf16.mxu1 %v1898_v30  ;;  %v1952_v29 = vld [vmem:[%s2428_s1 + $0x3b0] sm:$0xff]   ;;  %v1954_v30 = vld [vmem:[%s2428_s1 + $0x3f8] sm:$0xff]  }
  0x48   :  { %1741 = vmatpush3.bf16.msra.mxu0 %v1899_v31  ;;  %v1955_v31 = vld [vmem:[%s2428_s1 + $0x338] sm:$0xff]  }
  0x49   :  { %1742 = vmatprep.subr.bf16.mxu0 %v1901_v32  ;;  %v368_v32 = vrot.slane %v2290_v52, %v2082_v35 }
  0x4a   :  { %1763 = vmatpush3.bf16.msra.mxu1 %v1900_v33  ;;  %v1956_v33 = vld [vmem:[%s2428_s1 + $0x3b8] sm:$0xff]  }
  0x4b   :  { %1764 = vmatprep.subr.bf16.mxu1 %v1902_v34  ;;  %v384_v34 = vcombine.high %v368_v32, %v368_v32 }
  0x4c   :  { %1743 = vmatpush3.bf16.msra.mxu0 %v1903_v36 }
  0x4d   :  { %1744 = vmatprep.subr.bf16.mxu0 %v1905_v37  ;;  %v1519_v37 = vld [vmem:[%s2430_s2] ss:$0 sm:$0xff] }
  0x4e   :  { %1765 = vmatpush3.bf16.msra.mxu1 %v1904_v38 }
  0x4f   :  { %1766 = vmatprep.subr.bf16.mxu1 %v1906_v39 }
  0x50   :  { %1745 = vmatpush3.bf16.msra.mxu0 %v1907_v40 }
  0x51   :  { %1746 = vmatprep.subr.bf16.mxu0 %v1909_v41 }
  0x52   :  { %1767 = vmatpush3.bf16.msra.mxu1 %v1908_v42 }
  0x53   :  { %1768 = vmatprep.subr.bf16.mxu1 %v1910_v43 }
  0x54   :  { %1747 = vmatpush3.bf16.msra.mxu0 %v1911_v44 }
  0x55   :  { %1748 = vmatprep.subr.bf16.mxu0 %v1913_v45 }
  0x56   :  { %1769 = vmatpush3.bf16.msra.mxu1 %v1912_v47 }
  0x57   :  { %1770 = vmatprep.subr.bf16.mxu1 %v1914_v48 }
  0x58   :  { %1749 = vmatpush3.bf16.msra.mxu0 %v1915_v49 }
  0x59   :  { %1750 = vmatprep.subr.bf16.mxu0 %v1917_v50 }
  0x5a   :  { %1771 = vmatpush3.bf16.msra.mxu1 %v1916_v51 }
  0x5b   :  { %1772 = vmatprep.subr.bf16.mxu1 %v1918_v53 }
  0x5c   :  { %1751 = vmatpush3.bf16.msra.mxu0 %v1919_v54 }
  0x5d   :  { %1752 = vmatprep.subr.bf16.mxu0 %v1921_v55 }
  0x5e   :  { %1773 = vmatpush3.bf16.msra.mxu1 %v1920_v56 }
  0x5f   :  { %1774 = vmatprep.subr.bf16.mxu1 %v1922_v58 }
  0x60   :  { %1753 = vmatpush3.bf16.msra.mxu0 %v1923_v59 }
  0x61   :  { %1782 = vmatprep.subr.bf16.mxu0 %v1925_v61 }
  0x62   :  { %1775 = vmatpush3.bf16.msra.mxu1 %v1924_v62 }
  0x63   :  { %1364 = vmatmul.mubr.bf16.vlgmr.msra.gmra.mrb[8].mxu0 %v361_v60  ;;  %1804 = vmatprep.subr.bf16.mxu1 %v1926_v0 }
  0x64   :  { %1783 = vmatpush3.bf16.msra.mxu0 %v1927_v1  ;;  %1443 = vmatprep.mubr.bf16.mxu0 %v382_v63 }
  0x65   :  { %1404 = vmatmul.mubr.bf16.vlgmr.msra.gmra.mrb[8].mxu1 %v383_v2  ;;  %1784 = vmatprep.subr.bf16.mxu0 %v1929_v3 }
  0x66   :  { %1805 = vmatpush3.bf16.msra.mxu1 %v1928_v4  ;;  %1483 = vmatprep.mubr.bf16.mxu1 %v386_v5 }
  0x67   :  { %1806 = vmatprep.subr.bf16.mxu1 %v1930_v6 }
  0x68   :  { %1785 = vmatpush3.bf16.msra.mxu0 %v1931_v7 }
  0x69   :  { %1786 = vmatprep.subr.bf16.mxu0 %v1933_v8 }
  0x6a   :  { %1807 = vmatpush3.bf16.msra.mxu1 %v1932_v9 }
  0x6b   :  { %1808 = vmatprep.subr.bf16.mxu1 %v1934_v10 }
  0x6c   :  { %1787 = vmatpush3.bf16.msra.mxu0 %v1935_v11 }
  0x6d   :  { %1788 = vmatprep.subr.bf16.mxu0 %v1937_v12 }
  0x6e   :  { %1809 = vmatpush3.bf16.msra.mxu1 %v1936_v13 }
  0x6f   :  { %1810 = vmatprep.subr.bf16.mxu1 %v1938_v14 }
  0x70   :  { %1789 = vmatpush3.bf16.msra.mxu0 %v1939_v15 }
  0x71   :  { %1790 = vmatprep.subr.bf16.mxu0 %v1941_v16 }
  0x72   :  { %1811 = vmatpush3.bf16.msra.mxu1 %v1940_v17 }
  0x73   :  { %1812 = vmatprep.subr.bf16.mxu1 %v1942_v18 }
  0x74   :  { %1791 = vmatpush3.bf16.msra.mxu0 %v1943_v19 }
  0x75   :  { %1792 = vmatprep.subr.bf16.mxu0 %v1945_v20  ;;  %v1648_v20 = vld [vmem:[%s2431_s3] ss:$0 sm:$0xff] }
  0x76   :  { %1813 = vmatpush3.bf16.msra.mxu1 %v1944_v21 }
  0x77   :  { %1814 = vmatprep.subr.bf16.mxu1 %v1946_v22 }
  0x78   :  { %1793 = vmatpush3.bf16.msra.mxu0 %v1947_v23 }
  0x79   :  { %1794 = vmatprep.subr.bf16.mxu0 %v1949_v24  ;;  %v1505_v24 = vstv %s2432_s4 }
  0x7a   :  { %1815 = vmatpush3.bf16.msra.mxu1 %v1948_v25 }
  0x7b   :  { %1816 = vmatprep.subr.bf16.mxu1 %v1950_v26 }
  0x7c   :  { %1795 = vmatpush3.bf16.msra.mxu0 %v1951_v27 }
  0x7d   :  { %1796 = vmatprep.subr.bf16.mxu0 %v1953_v28 }
  0x7e   :  { %1817 = vmatpush3.bf16.msra.mxu1 %v1952_v29 }
  0x7f   :  { %1818 = vmatprep.subr.bf16.mxu1 %v1954_v30 }
  0x80   :  { %1797 = vmatpush3.bf16.msra.mxu0 %v1955_v31 }
  0x82   :  { %1819 = vmatpush3.bf16.msra.mxu1 %v1956_v33 }
  0x83   :  { %1444 = vmatmul.mubr.bf16.vlgmr.msra.gmra.mrb[12].mxu0 %v368_v32 }
  0x85   :  { %1484 = vmatmul.mubr.bf16.vlgmr.msra.gmra.mrb[12].mxu1 %v384_v34 }
  0xf6   :  { %v1666_v36 = vpop.f32.mrb[0].mxu0 }
  0xf7   :  { %v1667_v38 = vpop.f32.mrb[1].mxu0  ;;  %v1688_v39 = vpop.f32.mrb[0].mxu1 }
  0xf8   :  { %v1668_v40 = vadd.f32 %v1667_v38, %v1666_v36  ;;  %v1669_v35 = vpop.f32.mrb[2].mxu0  ;;  %v1689_v41 = vpop.f32.mrb[1].mxu1 }
  0xf9   :  { %v1670_v42 = vpop.f32.mrb[3].mxu0  ;;  %v1690_v44 = vadd.f32 %v1689_v41, %v1688_v39  ;;  %v1691_v45 = vpop.f32.mrb[2].mxu1 }
  0xfa   :  { %v1206_v43 = vadd.f32 %v1668_v40, %v1519_v37  ;;  %v1692_v46 = vpop.f32.mrb[3].mxu1 }
  0xfc   :  { %v1246_v47 = vadd.f32 %v1690_v44, %v1206_v43 }
 0x116   :  { %v1710_v48 = vpop.f32.mrb[4].mxu0 }
 0x117   :  { %v1711_v49 = vpop.f32.mrb[5].mxu0 }
 0x118   :  { %v1732_v50 = vpop.f32.mrb[4].mxu1  ;;  %v1712_v51 = vadd.f32 %v1711_v49, %v1710_v48  ;;  %v1713_v52 = vpop.f32.mrb[6].mxu0 }
 0x119   :  { %v1733_v53 = vpop.f32.mrb[5].mxu1  ;;  %v1714_v54 = vpop.f32.mrb[7].mxu0 }
 0x11a   :  { %v1286_v55 = vadd.f32 %v1712_v51, %v1246_v47  ;;  %v1734_v56 = vadd.f32 %v1733_v53, %v1732_v50  ;;  %v1735_v57 = vpop.f32.mrb[6].mxu1 }
 0x11b   :  { %v1736_v58 = vpop.f32.mrb[7].mxu1 }
 0x11c   :  { %v1326_v59 = vadd.f32 %v1734_v56, %v1286_v55 }
 0x136   :  { %v1754_v60 = vpop.f32.mrb[8].mxu0 }
 0x137   :  { %v1755_v61 = vpop.f32.mrb[9].mxu0 }
 0x138   :  { %v1776_v62 = vpop.f32.mrb[8].mxu1  ;;  %v1756_v63 = vadd.f32 %v1755_v61, %v1754_v60  ;;  %v1757_v0 = vpop.f32.mrb[10].mxu0 }
 0x139   :  { %v1777_v1 = vpop.f32.mrb[9].mxu1  ;;  %v1758_v2 = vpop.f32.mrb[11].mxu0 }
 0x13a   :  { %v1366_v3 = vadd.f32 %v1756_v63, %v1326_v59  ;;  %v1778_v4 = vadd.f32 %v1777_v1, %v1776_v62  ;;  %v1779_v5 = vpop.f32.mrb[10].mxu1 }
 0x13b   :  { %v1780_v6 = vpop.f32.mrb[11].mxu1 }
 0x13c   :  { %v1406_v7 = vadd.f32 %v1778_v4, %v1366_v3 }
 0x156   :  { %v1798_v8 = vpop.f32.mrb[12].mxu0 }
 0x157   :  { %v1799_v9 = vpop.f32.mrb[13].mxu0 }
 0x158   :  { %v1820_v10 = vpop.f32.mrb[12].mxu1  ;;  %v1800_v11 = vadd.f32 %v1799_v9, %v1798_v8  ;;  %v1801_v12 = vpop.f32.mrb[14].mxu0 }
 0x159   :  { %v1821_v13 = vpop.f32.mrb[13].mxu1  ;;  %v1802_v14 = vpop.f32.mrb[15].mxu0 }
 0x15a   :  { %v1446_v15 = vadd.f32 %v1800_v11, %v1406_v7  ;;  %v1822_v16 = vadd.f32 %v1821_v13, %v1820_v10  ;;  %v1823_v17 = vpop.f32.mrb[14].mxu1 }
 0x15b   :  { %v1824_v18 = vpop.f32.mrb[15].mxu1 }
 0x15c   :  { %v1486_v19 = vadd.f32 %v1822_v16, %v1446_v15 }
 0x15e   :  { %v1491_v21 = vmax.f32 %v1486_v19, 0.0 }
 0x160   :  { %v1499_v22 = vmul.f32 %v1648_v20, %v1491_v21 }
 0x162   :  { %v1501_v23 = vsel %vm1500_vm0, %v1499_v22, 0.0 }
 0x163   :  { %1502 = vadd.xlane.f32.xlu0 %v1501_v23 }
 0x1f0   :  { %v1503_v25 = vpop.xlane.xlu0 %1502 }
 0x1f1   :  { %v1506_v26 = vadd.f32 %v1505_v24, %v1503_v25 }
 0x1f3   :  { %v1649_v27 = vmul.f32 -1.442695, %v1506_v26 }
 0x1f5   :  { %1957 = vpow2.f32 %v1649_v27 }
 0x1ff   :  { %v1958_v28 = vpop.eup %1957 }
 0x200   :  { %v1510_v29 = vadd.f32 1.0, %v1958_v28 }
 0x202   :  { %1959 = vrcp.f32 %v1510_v29 }
 0x20c   :  { %v1960_v30 = vpop.eup %1959 }
 0x20d   :  { %1514 = vst.msk [vmem:[%s2433_s5] sm:$0x3] %vm1513_vm1, %v1960_v30 }

</bundles_post_ra>
